<compile_context>
chip_gen: v6e
topology: v6e:2x2x1
jax: 0.10.0
libtpu: 0.0.40
codegen_flags: <defaults>
</compile_context>

<pallas_src>
import functools

import jax
import jax.numpy as jnp
from jax.experimental import pallas as pl
from jax.experimental.pallas import tpu as pltpu


def _mlp_kernel(x_ref, *refs, num_hidden_layers):
    """refs = (w0, b0, ..., w_{L-1}, b_{L-1}, wo_row, bo, out_ref).

    Hidden layers run on the MXU; the 1-wide output layer runs on VPU+XLU
    (multiply + lane reduction) and is written lane-dense as (1, batch_tile).
    """
    out_ref = refs[-1]
    param_refs = refs[:-1]

    h = x_ref[...]
    # Hidden layers: Linear -> ReLU.  Python-unrolled at trace time; the bias
    # broadcast happens once per layer, never inside a traced loop.
    for i in range(num_hidden_layers):
        w = param_refs[2 * i][...]
        b = param_refs[2 * i + 1][...]
        h = jnp.dot(h, w, preferred_element_type=jnp.float32) + b
        h = jnp.maximum(h, 0.0)

    # Output layer (out_dim == 1): no MXU push for a 1-column result.
    wo = param_refs[-2][...]                            # (1, H_last) row of w_out
    bo = param_refs[-1][...]                            # (1, 1)
    y = jnp.sum(h * wo, axis=-1, keepdims=True) + bo    # (batch_tile, 1)
    # Relayout to lane-major and store a full-lane (1, batch_tile) block.
    out_ref[...] = y.T.astype(out_ref.dtype)


def _choose_batch_tile(B, d_in, itemsize, max_tile=512):
    """Largest 128-multiple tile <= max_tile that fits a safe VMEM budget."""
    if B <= 128:
        return B
    budget = 4 << 20  # per-buffer; double-buffered x block stays <= 8 MiB
    tile = min(max_tile, ((B + 127) // 128) * 128)
    while tile > 128 and tile * d_in * itemsize > budget:
        tile //= 2
    tile = max(128, (tile // 128) * 128)
    return tile


def task_decoder_forward(x, params, *, batch_tile=None):
    """Run the TaskDecoder MLP with a single Pallas kernel.

    x:      [B, D_in]
    params: list of (w, b) pairs, hidden layers first, output layer last.
            w: [in, out], b: [1, out]; the output layer has out == 1.
    Returns [B, 1] float32.
    """
    B, d_in = x.shape
    num_hidden_layers = len(params) - 1
    w_out, b_out = params[-1]
    assert w_out.shape[1] == 1, "TaskDecoder output layer must have out_dim == 1"

    if batch_tile is None:
        batch_tile = _choose_batch_tile(B, d_in, x.dtype.itemsize)
    if batch_tile != B:
        assert batch_tile % 128 == 0, (
            "batch_tile must be a multiple of 128 (or equal to B)")
    # Keep the double-buffered x block well under v7x's scoped VMEM budget.
    x_block_bytes = batch_tile * d_in * x.dtype.itemsize
    assert 2 * x_block_bytes <= 8 * 1024 * 1024, (
        f"batch_tile={batch_tile} makes the x block too large for VMEM "
        "(pass a smaller batch_tile)")

    # Pad the batch to a multiple of the tile so every grid step stores a
    # full lane-dense block; padded rows are sliced off afterwards.
    B_pad = pl.cdiv(B, batch_tile) * batch_tile
    x_padded = x if B_pad == B else jnp.pad(x, ((0, B_pad - B), (0, 0)))

    grid = (B_pad // batch_tile,)

    # x is tiled over the batch; parameters are small and fully resident.
    in_specs = [pl.BlockSpec((batch_tile, d_in), lambda i: (i, 0))]
    flat_params = []
    for (w, b) in params[:-1]:
        in_specs.append(pl.BlockSpec(w.shape, lambda i: (0, 0)))
        in_specs.append(pl.BlockSpec(b.shape, lambda i: (0, 0)))
        flat_params.extend([w, b])
    # Output-layer weight passed as a (1, H_last) row for the VPU broadcast.
    wo_row = w_out.T
    in_specs.append(pl.BlockSpec(wo_row.shape, lambda i: (0, 0)))
    in_specs.append(pl.BlockSpec(b_out.shape, lambda i: (0, 0)))
    flat_params.extend([wo_row, b_out])

    # Lane-dense output: (1, B_pad) array, each grid step writes a
    # (1, batch_tile) full-lane block; reshaped/sliced to (B, 1) in the wrapper.
    out_specs = pl.BlockSpec((1, batch_tile), lambda i: (0, i))

    kernel = functools.partial(_mlp_kernel, num_hidden_layers=num_hidden_layers)

    out_1b = pl.pallas_call(
        kernel,
        out_shape=jax.ShapeDtypeStruct((1, B_pad), jnp.float32),
        grid_spec=pltpu.PrefetchScalarGridSpec(
            num_scalar_prefetch=0,
            grid=grid,
            in_specs=in_specs,
            out_specs=out_specs,
        ),
        compiler_params=pltpu.CompilerParams(
            dimension_semantics=("parallel",),
        ),
    )(x_padded, *flat_params)

    return out_1b[0, :B].reshape(B, 1)


def init_task_decoder_params(key, input_dim, hidden_layers, out_dim=1):
    """Deterministic synthetic init of the Linear stack (shapes per __init__)."""
    params = []
    curr = input_dim
    dims = list(hidden_layers) + [out_dim]
    for d in dims:
        key, kw, kb = jax.random.split(key, 3)
        scale = 1.0 / jnp.sqrt(curr)
        w = jax.random.uniform(kw, (curr, d), jnp.float32, -scale, scale)
        b = jax.random.uniform(kb, (1, d), jnp.float32, -scale, scale)
        params.append((w, b))
        curr = d
    return params


def task_decoder_reference(x, params):
    """Pure-JAX reference of the PyTorch forward."""
    h = x
    for (w, b) in params[:-1]:
        h = jax.nn.relu(h @ w + b)
    w, b = params[-1]
    return h @ w + b


if __name__ == "__main__":
    # Config (mirrors BaseConfig fields used in __init__):
    #   vae_hidden_dim=32, action_embed_dim=16, obs_embed_dim=8
    #   -> curr_input_dim = 32 + 16 + 8*2 = 64; task_decoder.layers = [64, 32]
    vae_hidden_dim = 32
    action_embed_dim = 16
    obs_embed_dim = 8
    input_dim = vae_hidden_dim + action_embed_dim + obs_embed_dim * 2  # 64
    hidden_layers = [64, 32]

    key = jax.random.PRNGKey(0)
    key, kp = jax.random.split(key)
    params = init_task_decoder_params(kp, input_dim, hidden_layers, out_dim=1)

    ok = True
    errs = []

    # Case 1: tiny batch (single grid step, batch_tile == B path).
    key, kx = jax.random.split(key)
    x_small = jax.random.normal(kx, (8, input_dim), jnp.float32)
    out_small = jax.block_until_ready(task_decoder_forward(x_small, params))
    ref_small = task_decoder_reference(x_small, params)
    ok &= out_small.shape == (8, 1)
    ok &= bool(jnp.allclose(out_small, ref_small, atol=1e-5, rtol=1e-5))
    errs.append(float(jnp.max(jnp.abs(out_small - ref_small))))

    # Case 2: tiled batch (2 grid steps of 128 rows, lane-dense output blocks).
    key, kx2 = jax.random.split(key)
    x_big = jax.random.normal(kx2, (256, input_dim), jnp.float32)
    out_big = jax.block_until_ready(task_decoder_forward(x_big, params, batch_tile=128))
    ref_big = task_decoder_reference(x_big, params)
    ok &= out_big.shape == (256, 1)
    ok &= bool(jnp.allclose(out_big, ref_big, atol=1e-5, rtol=1e-5))
    errs.append(float(jnp.max(jnp.abs(out_big - ref_big))))

    # Case 3: non-128-divisible batch (exercises the padding path).
    key, kx3 = jax.random.split(key)
    x_odd = jax.random.normal(kx3, (200, input_dim), jnp.float32)
    out_odd = jax.block_until_ready(task_decoder_forward(x_odd, params))
    ref_odd = task_decoder_reference(x_odd, params)
    ok &= out_odd.shape == (200, 1)
    ok &= bool(jnp.allclose(out_odd, ref_odd, atol=1e-5, rtol=1e-5))
    errs.append(float(jnp.max(jnp.abs(out_odd - ref_odd))))

    assert ok, errs
    print("KERNEL_OK")
</pallas_src>

<mosaic_0001>
module attributes {stable_mosaic.version = 11 : i64} {
  func.func @_mlp_kernel(%arg0: i32, %arg1: memref<8x64xf32, #tpu.memory_space<vmem>>, %arg2: memref<64x64xf32, #tpu.memory_space<vmem>>, %arg3: memref<1x64xf32, #tpu.memory_space<vmem>>, %arg4: memref<64x32xf32, #tpu.memory_space<vmem>>, %arg5: memref<1x32xf32, #tpu.memory_space<vmem>>, %arg6: memref<1x32xf32, #tpu.memory_space<vmem>>, %arg7: memref<1x1xf32, #tpu.memory_space<vmem>>, %arg8: memref<1x8xf32, #tpu.memory_space<vmem>>) attributes {dimension_semantics = [#tpu.dimension_semantics<parallel>], iteration_bounds = array<i64: 1>, scalar_prefetch = 0 : i64, scratch_operands = 0 : i64, tpu.core_type = #tpu.core_type<tc>, window_params = [{transform_indices = @transform_0, window_bounds = array<i64: 8, 64>}, {pipeline_mode = #tpu.pipeline_mode<synchronous>, transform_indices = @transform_1, window_bounds = array<i64: 64, 64>}, {pipeline_mode = #tpu.pipeline_mode<synchronous>, transform_indices = @transform_2, window_bounds = array<i64: 1, 64>}, {pipeline_mode = #tpu.pipeline_mode<synchronous>, transform_indices = @transform_3, window_bounds = array<i64: 64, 32>}, {pipeline_mode = #tpu.pipeline_mode<synchronous>, transform_indices = @transform_4, window_bounds = array<i64: 1, 32>}, {pipeline_mode = #tpu.pipeline_mode<synchronous>, transform_indices = @transform_5, window_bounds = array<i64: 1, 32>}, {pipeline_mode = #tpu.pipeline_mode<synchronous>, transform_indices = @transform_6, window_bounds = array<i64: 1, 1>}, {transform_indices = @transform_7, window_bounds = array<i64: 1, 8>}]} {
    %c0 = arith.constant 0 : index
    %c0_0 = arith.constant 0 : index
    %0 = vector.load %arg1[%c0, %c0_0] : memref<8x64xf32, #tpu.memory_space<vmem>>, vector<8x64xf32>
    %c0_1 = arith.constant 0 : index
    %c0_2 = arith.constant 0 : index
    %1 = vector.load %arg2[%c0_1, %c0_2] : memref<64x64xf32, #tpu.memory_space<vmem>>, vector<64x64xf32>
    %c0_3 = arith.constant 0 : index
    %c0_4 = arith.constant 0 : index
    %2 = vector.load %arg3[%c0_3, %c0_4] : memref<1x64xf32, #tpu.memory_space<vmem>>, vector<1x64xf32>
    %cst = arith.constant dense<0.000000e+00> : vector<8x64xf32>
    %3 = tpu.matmul %0, %1, %cst {dimension_numbers = #tpu.dot_dimension_numbers<[1], [0], [0], [1], [0, 0, 1, 1], [], []>} : vector<8x64xf32>, vector<64x64xf32>, vector<8x64xf32> -> vector<8x64xf32>
    %4 = vector.broadcast %2 : vector<1x64xf32> to vector<8x64xf32>
    %5 = arith.addf %3, %4 : vector<8x64xf32>
    %cst_5 = arith.constant 0.000000e+00 : f32
    %6 = vector.broadcast %cst_5 : f32 to vector<8x64xf32>
    %7 = arith.maximumf %5, %6 : vector<8x64xf32>
    %c0_6 = arith.constant 0 : index
    %c0_7 = arith.constant 0 : index
    %8 = vector.load %arg4[%c0_6, %c0_7] : memref<64x32xf32, #tpu.memory_space<vmem>>, vector<64x32xf32>
    %c0_8 = arith.constant 0 : index
    %c0_9 = arith.constant 0 : index
    %9 = vector.load %arg5[%c0_8, %c0_9] : memref<1x32xf32, #tpu.memory_space<vmem>>, vector<1x32xf32>
    %cst_10 = arith.constant dense<0.000000e+00> : vector<8x32xf32>
    %10 = tpu.matmul %7, %8, %cst_10 {dimension_numbers = #tpu.dot_dimension_numbers<[1], [0], [0], [1], [0, 0, 1, 1], [], []>} : vector<8x64xf32>, vector<64x32xf32>, vector<8x32xf32> -> vector<8x32xf32>
    %11 = vector.broadcast %9 : vector<1x32xf32> to vector<8x32xf32>
    %12 = arith.addf %10, %11 : vector<8x32xf32>
    %cst_11 = arith.constant 0.000000e+00 : f32
    %13 = vector.broadcast %cst_11 : f32 to vector<8x32xf32>
    %14 = arith.maximumf %12, %13 : vector<8x32xf32>
    %c0_12 = arith.constant 0 : index
    %c0_13 = arith.constant 0 : index
    %15 = vector.load %arg6[%c0_12, %c0_13] : memref<1x32xf32, #tpu.memory_space<vmem>>, vector<1x32xf32>
    %c0_14 = arith.constant 0 : index
    %c0_15 = arith.constant 0 : index
    %16 = vector.load %arg7[%c0_14, %c0_15] : memref<1x1xf32, #tpu.memory_space<vmem>>, vector<1x1xf32>
    %17 = vector.broadcast %15 : vector<1x32xf32> to vector<8x32xf32>
    %18 = arith.mulf %14, %17 : vector<8x32xf32>
    %cst_16 = arith.constant dense<0.000000e+00> : vector<8xf32>
    %19 = vector.multi_reduction <add>, %18, %cst_16 [1] : vector<8x32xf32> to vector<8xf32>
    %20 = vector.shape_cast %19 : vector<8xf32> to vector<8x1xf32>
    %21 = vector.broadcast %16 : vector<1x1xf32> to vector<8x1xf32>
    %22 = arith.addf %20, %21 : vector<8x1xf32>
    %23 = tpu.transpose %22, [1, 0] : vector<8x1xf32> -> vector<1x8xf32>
    %c0_17 = arith.constant 0 : index
    %c0_18 = arith.constant 0 : index
    %24 = vector.load %arg8[%c0_17, %c0_18] : memref<1x8xf32, #tpu.memory_space<vmem>>, vector<1x8xf32>
    tpu.vector_store %arg8[%c0_17, %c0_18], %23 {strides = array<i32>} : memref<1x8xf32, #tpu.memory_space<vmem>>, vector<1x8xf32>,
    return
  }
  func.func @transform_0(%arg0: i32) -> (i32, i32) {
    %c0_i32 = arith.constant 0 : i32
    %c0_i32_0 = arith.constant 0 : i32
    return %arg0, %c0_i32 : i32, i32
  }
  func.func @transform_1(%arg0: i32) -> (i32, i32) {
    %c0_i32 = arith.constant 0 : i32
    %c0_i32_0 = arith.constant 0 : i32
    %c0_i32_1 = arith.constant 0 : i32
    return %c0_i32, %c0_i32_0 : i32, i32
  }
  func.func @transform_2(%arg0: i32) -> (i32, i32) {
    %c0_i32 = arith.constant 0 : i32
    %c0_i32_0 = arith.constant 0 : i32
    %c0_i32_1 = arith.constant 0 : i32
    return %c0_i32, %c0_i32_0 : i32, i32
  }
  func.func @transform_3(%arg0: i32) -> (i32, i32) {
    %c0_i32 = arith.constant 0 : i32
    %c0_i32_0 = arith.constant 0 : i32
    %c0_i32_1 = arith.constant 0 : i32
    return %c0_i32, %c0_i32_0 : i32, i32
  }
  func.func @transform_4(%arg0: i32) -> (i32, i32) {
    %c0_i32 = arith.constant 0 : i32
    %c0_i32_0 = arith.constant 0 : i32
    %c0_i32_1 = arith.constant 0 : i32
    return %c0_i32, %c0_i32_0 : i32, i32
  }
  func.func @transform_5(%arg0: i32) -> (i32, i32) {
    %c0_i32 = arith.constant 0 : i32
    %c0_i32_0 = arith.constant 0 : i32
    %c0_i32_1 = arith.constant 0 : i32
    return %c0_i32, %c0_i32_0 : i32, i32
  }
  func.func @transform_6(%arg0: i32) -> (i32, i32) {
    %c0_i32 = arith.constant 0 : i32
    %c0_i32_0 = arith.constant 0 : i32
    %c0_i32_1 = arith.constant 0 : i32
    return %c0_i32, %c0_i32_0 : i32, i32
  }
  func.func @transform_7(%arg0: i32) -> (i32, i32) {
    %c0_i32 = arith.constant 0 : i32
    %c0_i32_0 = arith.constant 0 : i32
    return %c0_i32, %arg0 : i32, i32
  }
}

</mosaic_0001>

<bundles_post_ra>
// kernel: tpu_custom_call.1
= control target key start
LH: loop header
LB: loop body
LE: loop exit
PB: predicated region body
PF: predicated region fallthrough
CT: control target
= control target key end

     0   :  { %s475_s0 = inlined_call_operand.vmem [shape: f32[8,64], index: 0, kind: input, shape index: {}]   ;;  %s476_s1 = inlined_call_operand.vmem [shape: f32[64,64], index: 1, kind: input, shape index: {}]   ;;  %s477_s2 = inlined_call_operand.vmem [shape: f32[1,64], index: 2, kind: input, shape index: {}]   ;;  %s478_s3 = inlined_call_operand.vmem [shape: f32[64,32], index: 3, kind: input, shape index: {}]   ;;  %s479_s4 = inlined_call_operand.vmem [shape: f32[1,32], index: 4, kind: input, shape index: {}]   ;;  %s480_s5 = inlined_call_operand.vmem [shape: f32[1,32], index: 5, kind: input, shape index: {}]   ;;  %s481_s6 = inlined_call_operand.<no memory space> [shape: f32[1,1], index: 6, kind: input, shape index: {}]   ;;  %s482_s7 = inlined_call_operand.hbm [shape: f32[1,8], index: 7, kind: output, shape index: {}]  }
   0x1   :  { %v12_v0 = vstv %s481_s6 }
   0x2   :  { %13 = vst [vmem:[#allocation2] sm:$0x1] %v12_v0 }
   0x3   :  { %v37_v1 = vld [vmem:[%s476_s1 + $0x38] sm:$0xff]  ;;  %v364_v2 = vmov 0.0   ;;  %v36_v3 = vld [vmem:[%s476_s1 + $0x30] sm:$0xff]  ;;  %vm365_vm0 = vmmov 0   ;;  %v35_v4 = vld [vmem:[%s476_s1 + $0x28] sm:$0xff] }
   0x4   :  { %301 = vmatprep.subr.mxu0 %v364_v2  ;;  %317 = vmatprep.mubr.msk.f32.mxu0 %vm365_vm0, %v364_v2  ;;  %v127_v5 = vld [vmem:[%s478_s3 + $0x38] sm:$0xff]  ;;  %v126_v6 = vld [vmem:[%s478_s3 + $0x30] sm:$0xff]  ;;  %v34_v7 = vld [vmem:[%s476_s1 + $0x20] sm:$0xff] }
   0x5   :  { %302 = vmatpush3.msra.mxu0 %v37_v1  ;;  %320 = vmatprep.subr.mxu1 %v364_v2  ;;  %v125_v8 = vld [vmem:[%s478_s3 + $0x28] sm:$0xff] }
   0x6   :  { %303 = vmatprep.subr.mxu0 %v364_v2  ;;  %336 = vmatprep.mubr.msk.f32.mxu1 %vm365_vm0, %v364_v2 }
   0x7   :  { %304 = vmatpush3.msra.mxu0 %v36_v3  ;;  %321 = vmatpush3.msra.mxu1 %v127_v5 }
   0x8   :  { %305 = vmatprep.subr.mxu0 %v364_v2  ;;  %322 = vmatprep.subr.mxu1 %v364_v2 }
   0x9   :  { %14 = vsyncpa [#allocation4], 0  ;;  %306 = vmatpush3.msra.mxu0 %v35_v4  ;;  %323 = vmatpush3.msra.mxu1 %v126_v6  ;;  %v33_v9 = vld [vmem:[%s476_s1 + $0x18] sm:$0xff]  ;;  %v124_v10 = vld [vmem:[%s478_s3 + $0x20] sm:$0xff]  ;;  %vm45_vm1 = vcmask 523264   ;;  %vm218_vm2 = vcmask 261120  }
   0xa   :  { %307 = vmatprep.subr.mxu0 %v364_v2  ;;  %324 = vmatprep.subr.mxu1 %v364_v2  ;;  %v32_v11 = vld [vmem:[%s476_s1 + $0x10] sm:$0xff]  ;;  %v123_v12 = vld [vmem:[%s478_s3 + $0x18] sm:$0xff]  ;;  %v31_v13 = vld [vmem:[%s476_s1 + $0x8] sm:$0xff]  ;;  %vm261_vm3 = vcmask 57344  }
   0xb   :  { %308 = vmatpush3.msra.mxu0 %v34_v7  ;;  %325 = vmatpush3.msra.mxu1 %v125_v8  ;;  %v30_v14 = vld [vmem:[%s476_s1] sm:$0xff]  ;;  %v122_v16 = vld [vmem:[%s478_s3 + $0x10] sm:$0xff]  ;;  %v121_v17 = vld [vmem:[%s478_s3 + $0x8] sm:$0xff] }
   0xc   :  { %309 = vmatprep.subr.mxu0 %v364_v2  ;;  %326 = vmatprep.subr.mxu1 %v364_v2  ;;  %v29_v15 = vld [vmem:[%s475_s0] sm:$0xff] }
   0xd   :  { %310 = vmatpush3.msra.mxu0 %v33_v9  ;;  %327 = vmatpush3.msra.mxu1 %v124_v10  ;;  %v120_v18 = vld [vmem:[%s478_s3] sm:$0xff] }
   0xe   :  { %311 = vmatprep.subr.mxu0 %v364_v2  ;;  %328 = vmatprep.subr.mxu1 %v364_v2  ;;  %v277_v19 = vld [vmem:[%s477_s2] ss:$0 sm:$0xff]  ;;  %s366_s2 = smov [#allocation3]  }
   0xf   :  { %312 = vmatpush3.msra.mxu0 %v32_v11  ;;  %329 = vmatpush3.msra.mxu1 %v123_v12  ;;  %v279_v24 = vld [vmem:[%s479_s4] ss:$0 sm:$0xff]  ;;  %s269_s15 = sshll.u32 %s366_s2, 4  ;;  %s270_s15 = int_to_ptr.vmem [resolvable:$true] %s269_s15 }
  0x10   :  { %313 = vmatprep.subr.mxu0 %v364_v2  ;;  %330 = vmatprep.subr.mxu1 %v364_v2  ;;  %v281_v28 = vld [vmem:[%s480_s5] ss:$0 sm:$0xff]  ;;  %s342_s4 = scalar_lea.vmem %s270_s15, 16  ;;  %s346_s16 = scalar_lea.vmem %s270_s15, 32 }
  0x11   :  { %314 = vmatpush3.msra.mxu0 %v31_v13  ;;  %331 = vmatpush3.msra.mxu1 %v122_v16  ;;  %v282_v32 = vld [vmem:[#allocation2] ss:$0 sm:$0xff]  ;;  %p343_p0 = scmp.ne.s32.totalorder %s270_s15, %s342_s4  ;;  %p347_p1 = scmp.lt.s32.totalorder %s270_s15, %s270_s15 }
  0x12   :  { %315 = vmatprep.subr.mxu0 %v364_v2  ;;  %332 = vmatprep.subr.mxu1 %v364_v2  ;;  %p348_p2 = scmp.lt.s32.totalorder %s346_s16, %s342_s4 }
  0x13   :  { %316 = vmatpush3.msra.mxu0 %v30_v14  ;;  %333 = vmatpush3.msra.mxu1 %v121_v17 }
  0x14   :  { %318 = vmatmul.mubr.msk.f32.vlgmr.msra.gmra.mxu0 %vm45_vm1, %v29_v15  ;;  %334 = vmatprep.subr.mxu1 %v364_v2  ;;  %p349_p3 = por %p348_p2, %p347_p1 }
  0x15   :  { %335 = vmatpush3.msra.mxu1 %v120_v18 }
  0x16   :  { %p350_p4 = pnand %p349_p3, %p343_p0 }
  0xd4   :  { %v115_v20 = vpop.f32.mrf.mxu0 }
  0xd5   :  { %v116_v21 = vadd.f32 %v277_v19, %v115_v20 }
  0xd6   :  { %v319_v22 = vpop.f32.mrf.mxu0 }
  0xd7   :  { %v119_v23 = vmax.f32 %v116_v21, 0.0 }
  0xd9   :  { %337 = vmatmul.mubr.msk.f32.vlgmr.msra.gmra.mxu1 %vm45_vm1, %v119_v23 }
 0x199   :  { %v204_v25 = vpop.f32.mrf.mxu1 }
 0x19a   :  { %v205_v26 = vadd.f32 %v279_v24, %v204_v25 }
 0x19b   :  { %v338_v27 = vpop.f32.mrf.mxu1 }
 0x19c   :  { %v208_v29 = vmax.f32 %v205_v26, 0.0 }
 0x19e   :  { %v217_v30 = vmul.f32 %v281_v28, %v208_v29 }
 0x1a0   :  { %v219_v31 = vsel %vm218_vm2, %v217_v30, 0.0 }
 0x1a1   :  { %220 = vadd.xlane.f32.xlu0 %v219_v31 }
 0x22a   :  { %v221_v33 = vpop.xlane.xlu0 %220 }
 0x22b   :  { %v228_v34 = vadd.f32 %v282_v32, %v221_v33 }
 0x22d   :  { %229 = vxpose.xlu0.b32.start.end [1/1] (short) (narrow) %v228_v34, 8 }
 0x2a9   :  { %v245_v35 = vpop.trf.xlu0 }
 0x2aa   :  { %262 = vst.msk [vmem:[#allocation3] sm:$0x1] %vm261_vm3, %v245_v35 }
 0x2ab   :  { %353 = shalt.err (!%p350_p4)
}
 0x2ac   :  { %272 = dma.vmem_to_hbm [thread:$0]  %s270_s15, 16, %s482_s7, [#allocation4]  }
 0x2ad   :  { %362 = dma.done.wait [#allocation4], 16  }
 0x2ae   :  { %363 = vsyncadd [#allocation4], 4294967280 }
 0x2af   :  { %276 = vsyncpa [#allocation4], 1 }

</bundles_post_ra>
